<compile_context>
chip_gen: v7x
topology: tpu7x:2x2x1
jax: 0.10.0
libtpu: 0.0.40
codegen_flags: <defaults>
</compile_context>

<pallas_src>
import math

import jax
import jax.numpy as jnp
from jax.experimental import pallas as pl
from jax.experimental.pallas import tpu as pltpu


def headnet_kernel(x_ref, w1_ref, b1_ref, w2_ref, b2_ref, o_ref):
    # hidden = relu(x @ W1 + b1)   -- bf16 MXU matmul, f32 accumulate
    h = jnp.dot(x_ref[...], w1_ref[...], preferred_element_type=jnp.float32)
    h = jnp.maximum(h + b1_ref[...], 0.0)          # (TB, H) + (1, H) broadcast
    # out = hidden @ W2 + b2       -- cast hidden once to bf16 for the MXU
    o = jnp.dot(h.astype(w2_ref.dtype), w2_ref[...],
                preferred_element_type=jnp.float32)
    o_ref[...] = (o + b2_ref[...]).astype(o_ref.dtype)


def headnet_forward(x, w1, b1, w2, b2, *, block_b=512):
    """Fused HeadNet forward.

    x : (B, D_in) f32
    w1: (D_in, H) f32, b1: (1, H) f32
    w2: (H, A)   f32, b2: (1, A) f32
    returns (B, A) f32
    """
    B, D_in = x.shape
    H = w1.shape[1]
    A = w2.shape[1]

    # Lane-dense output width (multiple of 128).
    A_pad = max(128, pl.cdiv(A, 128) * 128)
    # Batch tile: multiple of 8 sublanes, capped at block_b.
    tb = min(block_b, pl.cdiv(B, 8) * 8)
    B_pad = pl.cdiv(B, tb) * tb

    # bf16 operands for the MXU (halves weight/activation DMA bytes too).
    x_bf = x.astype(jnp.bfloat16)
    if B_pad != B:
        x_bf = jnp.pad(x_bf, ((0, B_pad - B), (0, 0)))
    w1_bf = w1.astype(jnp.bfloat16)
    w2_bf = w2.astype(jnp.bfloat16)
    b1_f = b1.astype(jnp.float32)
    b2_f = b2.astype(jnp.float32)
    if A_pad != A:
        w2_bf = jnp.pad(w2_bf, ((0, 0), (0, A_pad - A)))
        b2_f = jnp.pad(b2_f, ((0, 0), (0, A_pad - A)))

    grid = (B_pad // tb,)
    out = pl.pallas_call(
        headnet_kernel,
        out_shape=jax.ShapeDtypeStruct((B_pad, A_pad), jnp.float32),
        grid=grid,
        in_specs=[
            pl.BlockSpec((tb, D_in), lambda i: (i, 0)),   # x tile walks batch
            pl.BlockSpec((D_in, H), lambda i: (0, 0)),    # W1 resident
            pl.BlockSpec((1, H), lambda i: (0, 0)),       # b1 resident
            pl.BlockSpec((H, A_pad), lambda i: (0, 0)),   # W2 resident
            pl.BlockSpec((1, A_pad), lambda i: (0, 0)),   # b2 resident
        ],
        out_specs=pl.BlockSpec((tb, A_pad), lambda i: (i, 0)),
        compiler_params=pltpu.CompilerParams(
            # Batch tiles are independent -> shard across TCs on v7x.
            dimension_semantics=("parallel",),
        ),
    )(x_bf, w1_bf, b1_f, w2_bf, b2_f)

    return out[:B, :A]


def init_headnet_params(key, input_size, n_actions, hidden=512):
    """Deterministic init matching nn.Linear default (Kaiming-uniform style)."""
    k1, k2, k3, k4 = jax.random.split(key, 4)
    bound1 = 1.0 / math.sqrt(input_size)
    bound2 = 1.0 / math.sqrt(hidden)
    w1 = jax.random.uniform(k1, (input_size, hidden), jnp.float32, -bound1, bound1)
    b1 = jax.random.uniform(k2, (1, hidden), jnp.float32, -bound1, bound1)
    w2 = jax.random.uniform(k3, (hidden, n_actions), jnp.float32, -bound2, bound2)
    b2 = jax.random.uniform(k4, (1, n_actions), jnp.float32, -bound2, bound2)
    return w1, b1, w2, b2


if __name__ == "__main__":
    batch = 2
    input_size = 32
    n_actions = 8

    key = jax.random.PRNGKey(0)
    kx, kp = jax.random.split(key)
    x = jax.random.normal(kx, (batch, input_size), jnp.float32)
    w1, b1, w2, b2 = init_headnet_params(kp, input_size, n_actions)

    out = headnet_forward(x, w1, b1, w2, b2)
    jax.block_until_ready(out)
    assert out.shape == (batch, n_actions)

    # Reference in plain JAX (same semantics as the PyTorch forward).
    # Kernel uses bf16 MXU operands with f32 accumulation, so compare with a
    # tolerance consistent with bf16 input rounding.
    ref_f32 = jnp.maximum(x @ w1 + b1, 0.0) @ w2 + b2
    assert jnp.allclose(out, ref_f32, atol=5e-2, rtol=5e-2)

    # Tighter check against a reference that applies the same bf16 casts.
    h_ref = jnp.maximum(
        jnp.dot(x.astype(jnp.bfloat16), w1.astype(jnp.bfloat16),
                preferred_element_type=jnp.float32) + b1, 0.0)
    ref_bf16 = jnp.dot(h_ref.astype(jnp.bfloat16), w2.astype(jnp.bfloat16),
                       preferred_element_type=jnp.float32) + b2
    assert jnp.allclose(out, ref_bf16, atol=2e-3, rtol=2e-3)

    print("KERNEL_OK")
</pallas_src>

<mosaic_0001>
module attributes {stable_mosaic.version = 11 : i64} {
  func.func @headnet_kernel(%arg0: i32, %arg1: memref<8x32xbf16, #tpu.memory_space<vmem>>, %arg2: memref<32x512xbf16, #tpu.memory_space<vmem>>, %arg3: memref<1x512xf32, #tpu.memory_space<vmem>>, %arg4: memref<512x128xbf16, #tpu.memory_space<vmem>>, %arg5: memref<1x128xf32, #tpu.memory_space<vmem>>, %arg6: memref<8x128xf32, #tpu.memory_space<vmem>>) attributes {dimension_semantics = [#tpu.dimension_semantics<parallel>], iteration_bounds = array<i64: 1>, scalar_prefetch = 0 : i64, scratch_operands = 0 : i64, tpu.core_type = #tpu.core_type<tc>, window_params = [{transform_indices = @transform_0, window_bounds = array<i64: 8, 32>}, {pipeline_mode = #tpu.pipeline_mode<synchronous>, transform_indices = @transform_1, window_bounds = array<i64: 32, 512>}, {pipeline_mode = #tpu.pipeline_mode<synchronous>, transform_indices = @transform_2, window_bounds = array<i64: 1, 512>}, {pipeline_mode = #tpu.pipeline_mode<synchronous>, transform_indices = @transform_3, window_bounds = array<i64: 512, 128>}, {pipeline_mode = #tpu.pipeline_mode<synchronous>, transform_indices = @transform_4, window_bounds = array<i64: 1, 128>}, {transform_indices = @transform_5, window_bounds = array<i64: 8, 128>}]} {
    %c0 = arith.constant 0 : index
    %c0_0 = arith.constant 0 : index
    %0 = vector.load %arg1[%c0, %c0_0] : memref<8x32xbf16, #tpu.memory_space<vmem>>, vector<8x32xbf16>
    %c0_1 = arith.constant 0 : index
    %c0_2 = arith.constant 0 : index
    %1 = vector.load %arg2[%c0_1, %c0_2] : memref<32x512xbf16, #tpu.memory_space<vmem>>, vector<32x512xbf16>
    %cst = arith.constant dense<0.000000e+00> : vector<8x512xf32>
    %2 = tpu.matmul %0, %1, %cst {dimension_numbers = #tpu.dot_dimension_numbers<[1], [0], [0], [1], [0, 0, 1, 1], [], []>} : vector<8x32xbf16>, vector<32x512xbf16>, vector<8x512xf32> -> vector<8x512xf32>
    %c0_3 = arith.constant 0 : index
    %c0_4 = arith.constant 0 : index
    %3 = vector.load %arg3[%c0_3, %c0_4] : memref<1x512xf32, #tpu.memory_space<vmem>>, vector<1x512xf32>
    %4 = vector.broadcast %3 : vector<1x512xf32> to vector<8x512xf32>
    %5 = arith.addf %2, %4 : vector<8x512xf32>
    %cst_5 = arith.constant 0.000000e+00 : f32
    %6 = vector.broadcast %cst_5 : f32 to vector<8x512xf32>
    %7 = arith.maximumf %5, %6 : vector<8x512xf32>
    %8 = arith.truncf %7 : vector<8x512xf32> to vector<8x512xbf16>
    %c0_6 = arith.constant 0 : index
    %c0_7 = arith.constant 0 : index
    %9 = vector.load %arg4[%c0_6, %c0_7] : memref<512x128xbf16, #tpu.memory_space<vmem>>, vector<512x128xbf16>
    %cst_8 = arith.constant dense<0.000000e+00> : vector<8x128xf32>
    %10 = tpu.matmul %8, %9, %cst_8 {dimension_numbers = #tpu.dot_dimension_numbers<[1], [0], [0], [1], [0, 0, 1, 1], [], []>} : vector<8x512xbf16>, vector<512x128xbf16>, vector<8x128xf32> -> vector<8x128xf32>
    %c0_9 = arith.constant 0 : index
    %c0_10 = arith.constant 0 : index
    %11 = vector.load %arg5[%c0_9, %c0_10] : memref<1x128xf32, #tpu.memory_space<vmem>>, vector<1x128xf32>
    %12 = vector.broadcast %11 : vector<1x128xf32> to vector<8x128xf32>
    %13 = arith.addf %10, %12 : vector<8x128xf32>
    %c0_11 = arith.constant 0 : index
    %c0_12 = arith.constant 0 : index
    %14 = vector.load %arg6[%c0_11, %c0_12] : memref<8x128xf32, #tpu.memory_space<vmem>>, vector<8x128xf32>
    tpu.vector_store %arg6[%c0_11, %c0_12], %13 {strides = array<i32>} : memref<8x128xf32, #tpu.memory_space<vmem>>, vector<8x128xf32>,
    return
  }
  func.func @transform_0(%arg0: i32) -> (i32, i32) {
    %c0_i32 = arith.constant 0 : i32
    %c0_i32_0 = arith.constant 0 : i32
    return %arg0, %c0_i32 : i32, i32
  }
  func.func @transform_1(%arg0: i32) -> (i32, i32) {
    %c0_i32 = arith.constant 0 : i32
    %c0_i32_0 = arith.constant 0 : i32
    %c0_i32_1 = arith.constant 0 : i32
    return %c0_i32, %c0_i32_0 : i32, i32
  }
  func.func @transform_2(%arg0: i32) -> (i32, i32) {
    %c0_i32 = arith.constant 0 : i32
    %c0_i32_0 = arith.constant 0 : i32
    %c0_i32_1 = arith.constant 0 : i32
    return %c0_i32, %c0_i32_0 : i32, i32
  }
  func.func @transform_3(%arg0: i32) -> (i32, i32) {
    %c0_i32 = arith.constant 0 : i32
    %c0_i32_0 = arith.constant 0 : i32
    %c0_i32_1 = arith.constant 0 : i32
    return %c0_i32, %c0_i32_0 : i32, i32
  }
  func.func @transform_4(%arg0: i32) -> (i32, i32) {
    %c0_i32 = arith.constant 0 : i32
    %c0_i32_0 = arith.constant 0 : i32
    %c0_i32_1 = arith.constant 0 : i32
    return %c0_i32, %c0_i32_0 : i32, i32
  }
  func.func @transform_5(%arg0: i32) -> (i32, i32) {
    %c0_i32 = arith.constant 0 : i32
    %c0_i32_0 = arith.constant 0 : i32
    return %arg0, %c0_i32 : i32, i32
  }
}

</mosaic_0001>

<bundles_post_ra>
// kernel: tpu_custom_call.1
= control target key start
LH: loop header
LB: loop body
LE: loop exit
PB: predicated region body
PF: predicated region fallthrough
CT: control target
= control target key end

     0   :  { %10 = vsyncpa [#allocation3], 0  ;;  %s913_s0 = inlined_call_operand.hbm [shape: bf16[8,32], index: 0, kind: input, shape index: {}]   ;;  %s914_s1 = inlined_call_operand.hbm [shape: bf16[32,512], index: 1, kind: input, shape index: {}]   ;;  %s915_s2 = inlined_call_operand.vmem [shape: f32[1,512], index: 2, kind: input, shape index: {}]   ;;  %s916_s3 = inlined_call_operand.hbm [shape: bf16[512,128], index: 3, kind: input, shape index: {}]   ;;  %s917_s4 = inlined_call_operand.vmem [shape: f32[1,128], index: 4, kind: input, shape index: {}]   ;;  %s918_s5 = inlined_call_operand.hbm [shape: f32[8,128], index: 5, kind: output, shape index: {}]  }
   0x1   :  { %11 = vsyncpa [#allocation6], 0 }
   0x2   :  { %12 = vsyncpa [#allocation4], 0  ;;  %s820_s18 = smov [#allocation5]   ;;  %s726_s22 = scalar_lea.hbm %s914_s1, 1024 }
   0x3   :  { %s28_s19 = sshll.u32 %s820_s18, 4  ;;  %p727_p0 = scmp.ne.s32.totalorder %s914_s1, %s726_s22  ;;  %s29_s19 = int_to_ptr.vmem [resolvable:$true] %s28_s19 }
   0x4   :  { %p730_p1 = scmp.lt.u32.totalorder %s726_s22, %s914_s1 }
   0x6   :  { %p732_p2 = pnand %p730_p1, %p727_p0 }
   0x8   :  { %735 = shalt.err (!%p732_p2)
}
   0x9   :  { %s736_s27 = scalar_lea.vmem %s29_s19, 1024  ;;  %p741_p4 = scmp.lt.s32.totalorder %s29_s19, %s29_s19 }
   0xa   :  { %p737_p3 = scmp.ne.s32.totalorder %s29_s19, %s736_s27  ;;  %p742_p5 = scmp.lt.s32.totalorder %s736_s27, %s736_s27 }
   0xc   :  { %p743_p6 = por %p742_p5, %p741_p4 }
   0xe   :  { %p744_p7 = pnand %p743_p6, %p737_p3 }
  0x10   :  { %747 = shalt.err (!%p744_p7)
}
  0x11   :  { %s821_s28 = smov 256   ;;  %s822_s29 = smov 16  }
  0x12   :  { %34 = dma.hbm_to_vmem [thread:$0]  %s914_s1, 1024, %s29_s19, [#allocation6], %s821_s28, %s821_s28, %s822_s29  }
  0x13   :  { %s823_s7 = smov [#allocation2]   ;;  %s824_s9 = smov [#allocation7]  }
  0x14   :  { %s19_s8 = sshll.u32 %s823_s7, 4  ;;  %s42_s10 = sshll.u32 %s824_s9, 4  ;;  %s20_s8 = int_to_ptr.vmem [resolvable:$true] %s19_s8  ;;  %s43_s10 = int_to_ptr.vmem [resolvable:$true] %s42_s10 }
  0x15   :  { %s748_s13 = scalar_lea.hbm %s913_s0, 64 }
  0x16   :  { %p749_p8 = scmp.ne.s32.totalorder %s913_s0, %s748_s13  ;;  %p752_p9 = scmp.lt.u32.totalorder %s748_s13, %s913_s0 }
  0x18   :  { %p754_p10 = pnand %p752_p9, %p749_p8 }
  0x1a   :  { %757 = shalt.err (!%p754_p10)
}
  0x1b   :  { %s758_s1 = scalar_lea.vmem %s20_s8, 64  ;;  %p763_p12 = scmp.lt.s32.totalorder %s20_s8, %s20_s8 }
  0x1c   :  { %p759_p11 = scmp.ne.s32.totalorder %s20_s8, %s758_s1  ;;  %p764_p13 = scmp.lt.s32.totalorder %s758_s1, %s758_s1 }
  0x1e   :  { %p765_p0 = por %p764_p13, %p763_p12 }
  0x20   :  { %p766_p1 = pnand %p765_p0, %p759_p11 }
  0x22   :  { %769 = shalt.err (!%p766_p1)
}
  0x23   :  { %22 = dma.hbm_to_vmem [thread:$0]  %s913_s0, 64, %s20_s8, [#allocation3]  }
  0x24   :  { %s770_s22 = scalar_lea.hbm %s916_s3, 4096 }
  0x25   :  { %p771_p2 = scmp.ne.s32.totalorder %s916_s3, %s770_s22  ;;  %p774_p3 = scmp.lt.u32.totalorder %s770_s22, %s916_s3 }
  0x27   :  { %p776_p4 = pnand %p774_p3, %p771_p2 }
  0x29   :  { %779 = shalt.err (!%p776_p4)
}
  0x2a   :  { %s780_s27 = scalar_lea.vmem %s43_s10, 4096  ;;  %p785_p6 = scmp.lt.s32.totalorder %s43_s10, %s43_s10 }
  0x2b   :  { %p781_p5 = scmp.ne.s32.totalorder %s43_s10, %s780_s27  ;;  %p786_p7 = scmp.lt.s32.totalorder %s780_s27, %s780_s27 }
  0x2d   :  { %p787_p8 = por %p786_p7, %p785_p6 }
  0x2f   :  { %p788_p9 = pnand %p787_p8, %p781_p5 }
  0x31   :  { %791 = shalt.err (!%p788_p9)
}
  0x32   :  { %s825_s0 = smov 64   ;;  %s826_s28 = smov 4  }
  0x33   :  { %48 = dma.hbm_to_vmem [thread:$0]  %s916_s3, 4096, %s43_s10, [#allocation6], %s825_s0, %s825_s0, %s826_s28  }
  0x34   :  { %814 = dma.done.wait [#allocation3], 64  }
  0x35   :  { %815 = vsyncadd [#allocation3], 4294967232 }
  0x36   :  { %816 = dma.done.wait [#allocation6], 5120  }
  0x37   :  { %817 = vsyncadd [#allocation6], 4294962176  ;;  %v827_v0 = vmov 0   ;;  %v682_v1 = vld [vmem:[#allocation5 + $0x4] ss:$16 sps:$4 sm:$0xff]   ;;  %vm132_vm0 = vcmask 261120   ;;  %v72_v42 = vlaneseq }
  0x38   :  { %168 = vmatprep.mubr.bf16.mxu0 %v827_v0  ;;  %209 = vmatprep.mubr.bf16.mxu1 %v827_v0  ;;  %v684_v2 = vld [vmem:[#allocation5 + $0xc] ss:$16 sps:$4 sm:$0xff]   ;;  %v686_v3 = vld [vmem:[#allocation5] ss:$16 sps:$4 sm:$0xff]   ;;  %v687_v4 = vld [vmem:[#allocation5 + $0x8] ss:$16 sps:$4 sm:$0xff]  }
  0x39   :  { %136 = vmatprep.subr.bf16.mxu0 %v682_v1  ;;  %177 = vmatprep.subr.bf16.mxu1 %v684_v2  ;;  %v688_v5 = vld [vmem:[#allocation5 + $0x24] ss:$16 sps:$4 sm:$0xff]   ;;  %v690_v6 = vld [vmem:[#allocation5 + $0x2c] ss:$16 sps:$4 sm:$0xff]   ;;  %v692_v7 = vld [vmem:[#allocation5 + $0x20] ss:$16 sps:$4 sm:$0xff]  }
  0x3a   :  { %137 = vmatpush1.bf16.msra.mxu0 %v686_v3  ;;  %178 = vmatpush1.bf16.msra.mxu1 %v687_v4  ;;  %v693_v8 = vld [vmem:[#allocation5 + $0x28] ss:$16 sps:$4 sm:$0xff]   ;;  %v61_v9 = vld [vmem:[#allocation2] sm:$0xf]  ;;  %v694_v10 = vld [vmem:[#allocation7 + $0x40] sm:$0xff]   ;;  %v73_v43 = vshrl.u32 %v72_v42, 7 }
  0x3b   :  { %138 = vmatprep.subr.bf16.mxu0 %v688_v5  ;;  %179 = vmatprep.subr.bf16.mxu1 %v690_v6  ;;  %v695_v11 = vld [vmem:[#allocation7 + $0xc0] sm:$0xff]   ;;  %v698_v14 = vld [vmem:[#allocation7 + $0x48] sm:$0xff]   ;;  %v702_v18 = vld [vmem:[#allocation7 + $0x50] sm:$0xff]   ;;  %s828_s8 = smov [#allocation8]  }
  0x3c   :  { %v696_v12 = vld [vmem:[#allocation7] sm:$0xff]   ;;  %v699_v15 = vld [vmem:[#allocation7 + $0xc8] sm:$0xff]   ;;  %v703_v19 = vld [vmem:[#allocation7 + $0xd0] sm:$0xff]   ;;  %v74_v44 = vsub.s32 0, %v73_v43  ;;  %v82_v45 = vsub.s32 2, %v73_v43  ;;  %v78_v47 = vsub.s32 1, %v73_v43 }
  0x3d   :  { %v697_v13 = vld [vmem:[#allocation7 + $0x80] sm:$0xff]   ;;  %v700_v16 = vld [vmem:[#allocation7 + $0x8] sm:$0xff]   ;;  %v704_v20 = vld [vmem:[#allocation7 + $0x10] sm:$0xff]   ;;  %v86_v48 = vsub.s32 3, %v73_v43  ;;  %s576_s9 = sshll.u32 %s828_s8, 4  ;;  %s577_s9 = int_to_ptr.vmem [resolvable:$true] %s576_s9 }
  0x3e   :  { %139 = vmatpush1.bf16.msra.mxu0 %v692_v7  ;;  %180 = vmatpush1.bf16.msra.mxu1 %v693_v8  ;;  %v701_v17 = vld [vmem:[#allocation7 + $0x88] sm:$0xff]   ;;  %v705_v21 = vld [vmem:[#allocation7 + $0x90] sm:$0xff]   ;;  %v706_v22 = vld [vmem:[#allocation7 + $0x58] sm:$0xff]   ;;  %s792_s10 = scalar_lea.vmem %s577_s9, 128  ;;  %p797_p11 = scmp.lt.s32.totalorder %s577_s9, %s577_s9 }
  0x3f   :  { %629 = vmatprep.subr.bf16.mxu0 %v694_v10  ;;  %651 = vmatprep.subr.bf16.mxu1 %v695_v11  ;;  %v707_v23 = vld [vmem:[#allocation7 + $0xd8] sm:$0xff]   ;;  %v710_v26 = vld [vmem:[#allocation7 + $0x60] sm:$0xff]   ;;  %v714_v30 = vld [vmem:[#allocation7 + $0x68] sm:$0xff]   ;;  %p793_p10 = scmp.ne.s32.totalorder %s577_s9, %s792_s10  ;;  %p798_p12 = scmp.lt.s32.totalorder %s792_s10, %s792_s10 }
  0x40   :  { %v708_v24 = vld [vmem:[#allocation7 + $0x18] sm:$0xff]   ;;  %v711_v27 = vld [vmem:[#allocation7 + $0xe0] sm:$0xff]   ;;  %v715_v31 = vld [vmem:[#allocation7 + $0xe8] sm:$0xff]  }
  0x41   :  { %594 = vmatmul.mubr.msk.bf16.vlgmr.msra.gmra.mrb[0].mxu0 %vm132_vm0, %v61_v9  ;;  %595 = vmatmul.mubr.msk.bf16.vlgmr.msra.gmra.mrb[0].mxu1 %vm132_vm0, %v61_v9  ;;  %v709_v25 = vld [vmem:[#allocation7 + $0x98] sm:$0xff]   ;;  %v712_v28 = vld [vmem:[#allocation7 + $0x20] sm:$0xff]   ;;  %v716_v32 = vld [vmem:[#allocation7 + $0x28] sm:$0xff]   ;;  %p799_p13 = por %p798_p12, %p797_p11 }
  0x42   :  { %630 = vmatpush3.bf16.msra.mxu0 %v696_v12  ;;  %652 = vmatpush3.bf16.msra.mxu1 %v697_v13  ;;  %v713_v29 = vld [vmem:[#allocation7 + $0xa0] sm:$0xff]   ;;  %v717_v33 = vld [vmem:[#allocation7 + $0xa8] sm:$0xff]   ;;  %v718_v34 = vld [vmem:[#allocation7 + $0x70] sm:$0xff]  }
  0x43   :  { %631 = vmatprep.subr.bf16.mxu0 %v698_v14  ;;  %653 = vmatprep.subr.bf16.mxu1 %v699_v15  ;;  %v719_v35 = vld [vmem:[#allocation7 + $0xf0] sm:$0xff]   ;;  %v722_v38 = vld [vmem:[#allocation7 + $0x78] sm:$0xff]   ;;  %p800_p0 = pnand %p799_p13, %p793_p10 }
  0x44   :  { %v720_v36 = vld [vmem:[#allocation7 + $0x30] sm:$0xff]   ;;  %v723_v39 = vld [vmem:[#allocation7 + $0xf8] sm:$0xff]  }
  0x45   :  { %v721_v37 = vld [vmem:[#allocation7 + $0xb0] sm:$0xff]   ;;  %v724_v40 = vld [vmem:[#allocation7 + $0x38] sm:$0xff]  }
  0x46   :  { %632 = vmatpush3.bf16.msra.mxu0 %v700_v16  ;;  %654 = vmatpush3.bf16.msra.mxu1 %v701_v17  ;;  %v725_v41 = vld [vmem:[#allocation7 + $0xb8] sm:$0xff]  }
  0x47   :  { %633 = vmatprep.subr.bf16.mxu0 %v702_v18  ;;  %655 = vmatprep.subr.bf16.mxu1 %v703_v19  ;;  %v70_v46 = vld [vmem:[%s915_s2] sm:$0xf] }
  0x48   :  { %v75_v49 = vrot.slane %v70_v46, %v74_v44  ;;  %v83_v50 = vrot.slane %v70_v46, %v82_v45  ;;  %v79_v51 = vrot.slane %v70_v46, %v78_v47  ;;  %v87_v52 = vrot.slane %v70_v46, %v86_v48  ;;  %v596_v11 = vld [vmem:[%s917_s4] ss:$0 sm:$0xff] }
  0x4a   :  { %634 = vmatpush3.bf16.msra.mxu0 %v704_v20  ;;  %656 = vmatpush3.bf16.msra.mxu1 %v705_v21 }
  0x4b   :  { %635 = vmatprep.subr.bf16.mxu0 %v706_v22  ;;  %657 = vmatprep.subr.bf16.mxu1 %v707_v23 }
  0x4e   :  { %636 = vmatpush3.bf16.msra.mxu0 %v708_v24  ;;  %658 = vmatpush3.bf16.msra.mxu1 %v709_v25 }
  0x4f   :  { %637 = vmatprep.subr.bf16.mxu0 %v710_v26  ;;  %659 = vmatprep.subr.bf16.mxu1 %v711_v27 }
  0x52   :  { %638 = vmatpush3.bf16.msra.mxu0 %v712_v28  ;;  %660 = vmatpush3.bf16.msra.mxu1 %v713_v29 }
  0x53   :  { %639 = vmatprep.subr.bf16.mxu0 %v714_v30  ;;  %661 = vmatprep.subr.bf16.mxu1 %v715_v31 }
  0x56   :  { %640 = vmatpush3.bf16.msra.mxu0 %v716_v32  ;;  %662 = vmatpush3.bf16.msra.mxu1 %v717_v33 }
  0x57   :  { %641 = vmatprep.subr.bf16.mxu0 %v718_v34  ;;  %663 = vmatprep.subr.bf16.mxu1 %v719_v35 }
  0x5a   :  { %642 = vmatpush3.bf16.msra.mxu0 %v720_v36  ;;  %664 = vmatpush3.bf16.msra.mxu1 %v721_v37 }
  0x5b   :  { %643 = vmatprep.subr.bf16.mxu0 %v722_v38  ;;  %665 = vmatprep.subr.bf16.mxu1 %v723_v39 }
  0x5e   :  { %644 = vmatpush3.bf16.msra.mxu0 %v724_v40  ;;  %666 = vmatpush3.bf16.msra.mxu1 %v725_v41 }
 0x114   :  { %v170_v53 = vpop.f32.mrb[0].mxu0  ;;  %v211_v54 = vpop.f32.mrb[0].mxu1 }
 0x115   :  { %v171_v55 = vadd.f32 %v170_v53, %v75_v49  ;;  %v212_v56 = vadd.f32 %v211_v54, %v83_v50  ;;  %v172_v57 = vpop.f32.mrb[1].mxu0  ;;  %v213_v58 = vpop.f32.mrb[1].mxu1 }
 0x116   :  { %v173_v59 = vadd.f32 %v172_v57, %v79_v51  ;;  %v214_v60 = vadd.f32 %v213_v58, %v87_v52  ;;  %v174_v61 = vpop.f32.mrb[2].mxu0  ;;  %v215_v62 = vpop.f32.mrb[2].mxu1 }
 0x117   :  { %v218_v63 = vmax.f32 %v171_v55, 0.0  ;;  %v220_v0 = vmax.f32 %v212_v56, 0.0  ;;  %v175_v1 = vpop.f32.mrb[3].mxu0  ;;  %v216_v2 = vpop.f32.mrb[3].mxu1 }
 0x118   :  { %v219_v3 = vmax.f32 %v173_v59, 0.0  ;;  %v221_v4 = vmax.f32 %v214_v60, 0.0 }
 0x119   :  { %v224_v5 = vpack.c.bf16 %v220_v0, %v220_v0  ;;  %v222_v8 = vpack.c.bf16 %v218_v63, %v218_v63 }
 0x11a   :  { %v223_v6 = vpack.c.bf16 %v219_v3, %v219_v3  ;;  %v225_v7 = vpack.c.bf16 %v221_v4, %v221_v4 }
 0x11c   :  { %521 = vmatprep.mubr.bf16.mxu0 %v223_v6  ;;  %561 = vmatprep.mubr.bf16.mxu1 %v225_v7 }
 0x11d   :  { %522 = vmatmul.mubr.bf16.vlgmr.msra.gmra.mrb[4].mxu0 %v222_v8  ;;  %562 = vmatmul.mubr.bf16.vlgmr.msra.gmra.mrb[4].mxu1 %v224_v5 }
 0x1f0   :  { %v645_v9 = vpop.f32.mrb[4].mxu0  ;;  %v667_v10 = vpop.f32.mrb[4].mxu1 }
 0x1f1   :  { %v646_v12 = vpop.f32.mrb[5].mxu0  ;;  %v668_v13 = vpop.f32.mrb[5].mxu1 }
 0x1f2   :  { %v647_v14 = vadd.f32 %v646_v12, %v645_v9  ;;  %v669_v15 = vadd.f32 %v668_v13, %v667_v10  ;;  %v648_v16 = vpop.f32.mrb[6].mxu0  ;;  %v670_v17 = vpop.f32.mrb[6].mxu1 }
 0x1f3   :  { %v649_v18 = vpop.f32.mrb[7].mxu0  ;;  %v671_v19 = vpop.f32.mrb[7].mxu1 }
 0x1f4   :  { %v524_v20 = vadd.f32 %v647_v14, %v596_v11 }
 0x1f6   :  { %v564_v21 = vadd.f32 %v669_v15, %v524_v20 }
 0x1f8   :  { %569 = vst [vmem:[#allocation8] sm:$0xff] %v564_v21 }
 0x1f9   :  { %803 = shalt.err (!%p800_p0)
}
 0x1fa   :  { %s804_s12 = scalar_lea.hbm %s918_s5, 128 }
 0x1fb   :  { %p805_p1 = scmp.ne.s32.totalorder %s918_s5, %s804_s12  ;;  %p808_p2 = scmp.lt.u32.totalorder %s804_s12, %s918_s5 }
 0x1fd   :  { %p810_p3 = pnand %p808_p2, %p805_p1 }
 0x1ff   :  { %813 = shalt.err (!%p810_p3)
}
 0x200   :  { %579 = dma.vmem_to_hbm [thread:$0]  %s577_s9, 128, %s918_s5, [#allocation4]  }
 0x201   :  { %818 = dma.done.wait [#allocation4], 128  }
 0x202   :  { %819 = vsyncadd [#allocation4], 4294967168 }
 0x203   :  { %583 = vsyncpa [#allocation3], 1 }
 0x204   :  { %584 = vsyncpa [#allocation6], 1 }
 0x205   :  { %585 = vsyncpa [#allocation4], 1 }

</bundles_post_ra>
